<compile_context>
chip_gen: v7x
topology: tpu7x:2x2x1
jax: 0.10.0
libtpu: 0.0.40
codegen_flags: <defaults>
</compile_context>

<pallas_src>
import functools
import math

import jax
import jax.numpy as jnp
from jax.experimental import pallas as pl
from jax.experimental.pallas import tpu as pltpu


def _nll_kernel(cols_ref, rows_ref, out_ref, num_acc_ref, *, sub_i):
    """One (tile_i, tile_j) slab of the O(N^2) Cox risk-set numerator.

    cols_ref    : (tile_i, 2)  streamed i-blocks: col 0 = y[i], col 1 = exp(rp[i]-max(rp))
                                (zero exp in padded rows).
    rows_ref    : (4, tile_j)  resident packed j-rows: y[j], rp[j]-max(rp), e[j], den[j].
    out_ref     : (1, tile_j)  (rp[j] - log_loss[j]) * e[j], written on the last i step.
    num_acc_ref : (1, tile_j)  f32 VMEM accumulator for num[j] = sum_i exp[i]*keep[i,j].
    """
    i_idx = pl.program_id(1)

    @pl.when(i_idx == 0)
    def _init():
        num_acc_ref[...] = jnp.zeros_like(num_acc_ref)

    tile_i = cols_ref.shape[0]
    tile_j = rows_ref.shape[1]
    n_sub = tile_i // sub_i

    # Hoisted broadcast of this j-tile's y values (reused by every i-chunk).
    y_row = jnp.broadcast_to(rows_ref[0:1, :], (sub_i, tile_j))    # (sub_i, tile_j)

    def body(s, num_part):
        start = pl.multiple_of(s * sub_i, sub_i)
        y_c = cols_ref[pl.ds(start, sub_i), 0:1]                   # (sub_i, 1)
        exp_c = cols_ref[pl.ds(start, sub_i), 1:2]                 # (sub_i, 1)
        # Risk-set indicator keep[i, j] = (y[j] <= y[i]); direct compare, no subtract.
        keep = y_row <= y_c                                        # (sub_i, tile_j) bool
        num_part += jnp.sum(jnp.where(keep, exp_c, 0.0), axis=0, keepdims=True)
        return num_part

    num_part = jax.lax.fori_loop(
        0, n_sub, body,
        jnp.zeros(num_acc_ref.shape, num_acc_ref.dtype),
        unroll=True)
    num_acc_ref[...] += num_part

    @pl.when(i_idx == pl.num_programs(1) - 1)
    def _finalize():
        rp_row = rows_ref[1:2, :]
        e_row = rows_ref[2:3, :]
        den_row = rows_ref[3:4, :]
        # Clamp guards exp underflow (num == 0 -> log = -inf -> NaN via inf*0).
        num = jnp.maximum(num_acc_ref[...], jnp.finfo(jnp.float32).tiny)
        # True log_loss = max(rp) + log(num) - log(den); the max(rp) shift cancels
        # against rp_row (which is already rp - max(rp)).
        log_loss = jnp.log(num) - jnp.log(den_row)
        out_ref[...] = (rp_row - log_loss) * e_row


def _round_up(x, m):
    return ((x + m - 1) // m) * m


def _vmem_limit_bytes():
    # v5e / v6e have 128 MiB physical VMEM, v7x only 64 MiB.  The i-tiled kernel
    # only needs a few MiB, so just pick a comfortable per-chip scoped limit.
    cap = 64 * 1024 * 1024
    try:
        cap = int(getattr(pltpu.get_tpu_info(), "vmem_capacity_bytes", cap))
    except Exception:
        pass
    return int(min(96 * 1024 * 1024, max(32 * 1024 * 1024, cap // 2)))


def negative_log_likelihood(risk_pred, y, e, model_weights, l2_reg, *,
                            tile_j=512, tile_i=512, sub_i=64):
    """Pallas equivalent of NegativeLogLikelihood(l2_reg).forward(risk_pred, y, e, model)."""
    rp = jnp.asarray(risk_pred, jnp.float32).reshape(-1)
    yv = jnp.asarray(y, jnp.float32).reshape(-1)
    ev = jnp.asarray(e, jnp.float32).reshape(-1)
    n = rp.shape[0]

    # ---- tile sizing --------------------------------------------------------
    # Lane tile: multiple of 128, large enough to amortize ~0.35us/grid-step and
    # give lane-dense (unmasked) output stores; shrink for small batches so the
    # j-grid keeps >= 2 tiles (both v7x TensorCores busy under "parallel").
    tile_j = max(128, min(int(tile_j), 2048)) // 128 * 128
    while tile_j > 128 and _round_up(n, tile_j) // tile_j < 2:
        tile_j //= 2
    tile_j = max(128, tile_j // 128 * 128)

    sub_i = max(8, int(sub_i)) // 8 * 8
    tile_i = max(sub_i, min(int(tile_i), 4096))
    tile_i = min(_round_up(tile_i, sub_i), _round_up(n, sub_i))

    n_pad = _round_up(n, math.lcm(tile_i, tile_j))
    pad = n_pad - n
    num_j = n_pad // tile_j
    num_i = n_pad // tile_i

    # ---- hoisted / O(N log N) pre-computation -------------------------------
    m = jnp.max(rp)
    rp_s = rp - m                    # log-sum-exp-safe shift (cancels in the output)
    exp_s = jnp.exp(rp_s)

    # den[j] = #{i : y[i] >= y[j]} is an exact integer count: compute it once with
    # sort + searchsorted instead of re-deriving it on the N^2 plane inside the
    # kernel (removes the mask cast + one full-plane reduction from the VALU slot).
    y_sorted = jnp.sort(yv)
    den = (n - jnp.searchsorted(y_sorted, yv, side="left")).astype(jnp.float32)

    if pad:
        # Padded samples: y below every real y (never in a real risk set),
        # exp contribution 0, event flag 0, den 1 (any positive; zeroed by e=0).
        y_fill = jnp.full((pad,), jnp.min(yv) - 1.0, jnp.float32)
        zeros = jnp.zeros((pad,), jnp.float32)
        yv_p = jnp.concatenate([yv, y_fill])
        rp_p = jnp.concatenate([rp_s, zeros])
        exp_p = jnp.concatenate([exp_s, zeros])
        ev_p = jnp.concatenate([ev, zeros])
        den_p = jnp.concatenate([den, jnp.ones((pad,), jnp.float32)])
    else:
        yv_p, rp_p, exp_p, ev_p, den_p = yv, rp_s, exp_s, ev, den

    cols = jnp.stack([yv_p, exp_p], axis=1)               # (n_pad, 2) streamed i-blocks
    rows = jnp.stack([yv_p, rp_p, ev_p, den_p], axis=0)   # (4, n_pad) packed j-rows

    contrib = pl.pallas_call(
        functools.partial(_nll_kernel, sub_i=sub_i),
        out_shape=jax.ShapeDtypeStruct((1, n_pad), jnp.float32),
        grid=(num_j, num_i),                               # reduction axis (i) last
        in_specs=[
            pl.BlockSpec((tile_i, 2), lambda j, i: (i, 0)),   # streamed y/exp columns
            pl.BlockSpec((4, tile_j), lambda j, i: (0, j)),   # resident packed rows
        ],
        out_specs=pl.BlockSpec((1, tile_j), lambda j, i: (0, j)),
        scratch_shapes=[pltpu.VMEM((1, tile_j), jnp.float32)],
        compiler_params=pltpu.CompilerParams(
            dimension_semantics=("parallel", "arbitrary"),
            vmem_limit_bytes=_vmem_limit_bytes(),
        ),
    )(cols, rows)

    neg_log_loss = -jnp.sum(contrib) / jnp.sum(ev)

    # Regularization(order=2): sum of Frobenius norms of the weight matrices,
    # kept out of the kernel (tiny scalar reduction; no per-l2_reg recompiles).
    reg = sum(jnp.sqrt(jnp.sum(jnp.asarray(w, jnp.float32) ** 2)) for w in model_weights)
    return neg_log_loss + l2_reg * reg


def _reference_loss(risk_pred, y, e, model_weights, l2_reg):
    """Pure-JAX transcription of the PyTorch forward, for validation."""
    mask = jnp.ones((y.shape[0], y.shape[0]), jnp.float32)
    mask = jnp.where((y.T - y) > 0, 0.0, mask)
    log_loss = jnp.exp(risk_pred) * mask
    log_loss = jnp.sum(log_loss, axis=0) / jnp.sum(mask, axis=0)
    log_loss = jnp.log(log_loss).reshape(-1, 1)
    neg_log_loss = -jnp.sum((risk_pred - log_loss) * e) / jnp.sum(e)
    reg = sum(jnp.sqrt(jnp.sum(w * w)) for w in model_weights)
    return neg_log_loss + l2_reg * reg


if __name__ == "__main__":
    key = jax.random.PRNGKey(0)
    k1, k2, k3, k4, k5 = jax.random.split(key, 5)

    N, D, H = 200, 16, 32          # batch (non-multiple of 128 to exercise padding), in-feat, hidden
    l2_reg = 0.05

    risk_pred = jax.random.normal(k1, (N, 1), jnp.float32)
    y = jax.random.uniform(k2, (N, 1), jnp.float32) * 10.0            # survival times
    e = (jax.random.uniform(k3, (N, 1)) > 0.3).astype(jnp.float32)    # event flags
    e = e.at[0, 0].set(1.0)        # ensure sum(e) > 0

    # Deterministic synthetic "model": two linear-layer weight matrices
    # (biases would be skipped by Regularization anyway).
    w1 = jax.random.normal(k4, (H, D), jnp.float32) * 0.1   # fc1.weight
    w2 = jax.random.normal(k5, (1, H), jnp.float32) * 0.1   # fc2.weight

    loss = negative_log_likelihood(risk_pred, y, e, (w1, w2), l2_reg)
    loss = jax.block_until_ready(loss)

    ref = _reference_loss(risk_pred, y, e, (w1, w2), l2_reg)
    assert jnp.isfinite(loss), "kernel produced non-finite loss"
    assert jnp.allclose(loss, ref, rtol=1e-5, atol=1e-5), (loss, ref)

    print("KERNEL_OK")
</pallas_src>

<mosaic_0001>
module attributes {stable_mosaic.version = 11 : i64} {
  func.func @_nll_kernel(%arg0: i32, %arg1: i32, %arg2: memref<256x2xf32, #tpu.memory_space<vmem>>, %arg3: memref<4x128xf32, #tpu.memory_space<vmem>>, %arg4: memref<1x128xf32, #tpu.memory_space<vmem>>, %arg5: memref<1x128xf32, #tpu.memory_space<vmem>>) attributes {dimension_semantics = [#tpu.dimension_semantics<parallel>, #tpu.dimension_semantics<arbitrary>], iteration_bounds = array<i64: 2, 1>, scalar_prefetch = 0 : i64, scratch_operands = 1 : i64, tpu.core_type = #tpu.core_type<tc>, window_params = [{transform_indices = @transform_0, window_bounds = array<i64: 256, 2>}, {transform_indices = @transform_1, window_bounds = array<i64: 4, 128>}, {transform_indices = @transform_2, window_bounds = array<i64: 1, 128>}]} {
    %c0_i32 = arith.constant 0 : i32
    %0 = arith.cmpi eq, %arg1, %c0_i32 : i32
    %1 = arith.extui %0 : i1 to i32
    %c0_i32_0 = arith.constant 0 : i32
    %2 = arith.cmpi ne, %1, %c0_i32_0 : i32
    scf.if %2 {
      %cst_27 = arith.constant 0.000000e+00 : f32
      %73 = vector.broadcast %cst_27 : f32 to vector<1x128xf32>
      %c0_28 = arith.constant 0 : index
      %c0_29 = arith.constant 0 : index
      %74 = vector.load %arg5[%c0_28, %c0_29] : memref<1x128xf32, #tpu.memory_space<vmem>>, vector<1x128xf32>
      tpu.vector_store %arg5[%c0_28, %c0_29], %73 {strides = array<i32>} : memref<1x128xf32, #tpu.memory_space<vmem>>, vector<1x128xf32>,
    } else {
    }
    %c0 = arith.constant 0 : index
    %c0_1 = arith.constant 0 : index
    %3 = vector.load %arg3[%c0, %c0_1] : memref<4x128xf32, #tpu.memory_space<vmem>>, vector<1x128xf32>
    %4 = vector.shape_cast %3 : vector<1x128xf32> to vector<1x128xf32>
    %5 = vector.broadcast %4 : vector<1x128xf32> to vector<64x128xf32>
    %cst = arith.constant 0.000000e+00 : f32
    %6 = vector.broadcast %cst : f32 to vector<1x128xf32>
    %c0_i32_2 = arith.constant 0 : i32
    %c64_i32 = arith.constant 64 : i32
    %7 = arith.muli %c0_i32_2, %c64_i32 : i32
    %8 = tpu.assume_multiple %7, 64 : i32
    %9 = arith.index_cast %8 : i32 to index
    %c0_3 = arith.constant 0 : index
    %10 = vector.load %arg2[%9, %c0_3] : memref<256x2xf32, #tpu.memory_space<vmem>>, vector<64x1xf32>
    %11 = arith.index_cast %8 : i32 to index
    %c1 = arith.constant 1 : index
    %12 = vector.load %arg2[%11, %c1] : memref<256x2xf32, #tpu.memory_space<vmem>>, vector<64x1xf32>
    %13 = vector.broadcast %10 : vector<64x1xf32> to vector<64x128xf32>
    %14 = arith.cmpf ole, %5, %13 : vector<64x128xf32>
    %cst_4 = arith.constant 0.000000e+00 : f32
    %15 = vector.shape_cast %12 : vector<64x1xf32> to vector<64x1xf32>
    %16 = vector.broadcast %15 : vector<64x1xf32> to vector<64x128xf32>
    %17 = vector.broadcast %cst_4 : f32 to vector<64x128xf32>
    %18 = arith.select %14, %16, %17 : vector<64x128xi1>, vector<64x128xf32>
    %cst_5 = arith.constant dense<0.000000e+00> : vector<128xf32>
    %19 = vector.multi_reduction <add>, %18, %cst_5 [0] : vector<64x128xf32> to vector<128xf32>
    %20 = vector.shape_cast %19 : vector<128xf32> to vector<1x128xf32>
    %21 = arith.addf %6, %20 : vector<1x128xf32>
    %c1_i32 = arith.constant 1 : i32
    %c64_i32_6 = arith.constant 64 : i32
    %22 = arith.muli %c1_i32, %c64_i32_6 : i32
    %23 = tpu.assume_multiple %22, 64 : i32
    %24 = arith.index_cast %23 : i32 to index
    %c0_7 = arith.constant 0 : index
    %25 = vector.load %arg2[%24, %c0_7] : memref<256x2xf32, #tpu.memory_space<vmem>>, vector<64x1xf32>
    %26 = arith.index_cast %23 : i32 to index
    %c1_8 = arith.constant 1 : index
    %27 = vector.load %arg2[%26, %c1_8] : memref<256x2xf32, #tpu.memory_space<vmem>>, vector<64x1xf32>
    %28 = vector.broadcast %25 : vector<64x1xf32> to vector<64x128xf32>
    %29 = arith.cmpf ole, %5, %28 : vector<64x128xf32>
    %cst_9 = arith.constant 0.000000e+00 : f32
    %30 = vector.shape_cast %27 : vector<64x1xf32> to vector<64x1xf32>
    %31 = vector.broadcast %30 : vector<64x1xf32> to vector<64x128xf32>
    %32 = vector.broadcast %cst_9 : f32 to vector<64x128xf32>
    %33 = arith.select %29, %31, %32 : vector<64x128xi1>, vector<64x128xf32>
    %cst_10 = arith.constant dense<0.000000e+00> : vector<128xf32>
    %34 = vector.multi_reduction <add>, %33, %cst_10 [0] : vector<64x128xf32> to vector<128xf32>
    %35 = vector.shape_cast %34 : vector<128xf32> to vector<1x128xf32>
    %36 = arith.addf %21, %35 : vector<1x128xf32>
    %c2_i32 = arith.constant 2 : i32
    %c64_i32_11 = arith.constant 64 : i32
    %37 = arith.muli %c2_i32, %c64_i32_11 : i32
    %38 = tpu.assume_multiple %37, 64 : i32
    %39 = arith.index_cast %38 : i32 to index
    %c0_12 = arith.constant 0 : index
    %40 = vector.load %arg2[%39, %c0_12] : memref<256x2xf32, #tpu.memory_space<vmem>>, vector<64x1xf32>
    %41 = arith.index_cast %38 : i32 to index
    %c1_13 = arith.constant 1 : index
    %42 = vector.load %arg2[%41, %c1_13] : memref<256x2xf32, #tpu.memory_space<vmem>>, vector<64x1xf32>
    %43 = vector.broadcast %40 : vector<64x1xf32> to vector<64x128xf32>
    %44 = arith.cmpf ole, %5, %43 : vector<64x128xf32>
    %cst_14 = arith.constant 0.000000e+00 : f32
    %45 = vector.shape_cast %42 : vector<64x1xf32> to vector<64x1xf32>
    %46 = vector.broadcast %45 : vector<64x1xf32> to vector<64x128xf32>
    %47 = vector.broadcast %cst_14 : f32 to vector<64x128xf32>
    %48 = arith.select %44, %46, %47 : vector<64x128xi1>, vector<64x128xf32>
    %cst_15 = arith.constant dense<0.000000e+00> : vector<128xf32>
    %49 = vector.multi_reduction <add>, %48, %cst_15 [0] : vector<64x128xf32> to vector<128xf32>
    %50 = vector.shape_cast %49 : vector<128xf32> to vector<1x128xf32>
    %51 = arith.addf %36, %50 : vector<1x128xf32>
    %c3_i32 = arith.constant 3 : i32
    %c64_i32_16 = arith.constant 64 : i32
    %52 = arith.muli %c3_i32, %c64_i32_16 : i32
    %53 = tpu.assume_multiple %52, 64 : i32
    %54 = arith.index_cast %53 : i32 to index
    %c0_17 = arith.constant 0 : index
    %55 = vector.load %arg2[%54, %c0_17] : memref<256x2xf32, #tpu.memory_space<vmem>>, vector<64x1xf32>
    %56 = arith.index_cast %53 : i32 to index
    %c1_18 = arith.constant 1 : index
    %57 = vector.load %arg2[%56, %c1_18] : memref<256x2xf32, #tpu.memory_space<vmem>>, vector<64x1xf32>
    %58 = vector.broadcast %55 : vector<64x1xf32> to vector<64x128xf32>
    %59 = arith.cmpf ole, %5, %58 : vector<64x128xf32>
    %cst_19 = arith.constant 0.000000e+00 : f32
    %60 = vector.shape_cast %57 : vector<64x1xf32> to vector<64x1xf32>
    %61 = vector.broadcast %60 : vector<64x1xf32> to vector<64x128xf32>
    %62 = vector.broadcast %cst_19 : f32 to vector<64x128xf32>
    %63 = arith.select %59, %61, %62 : vector<64x128xi1>, vector<64x128xf32>
    %cst_20 = arith.constant dense<0.000000e+00> : vector<128xf32>
    %64 = vector.multi_reduction <add>, %63, %cst_20 [0] : vector<64x128xf32> to vector<128xf32>
    %65 = vector.shape_cast %64 : vector<128xf32> to vector<1x128xf32>
    %66 = arith.addf %51, %65 : vector<1x128xf32>
    %c4_i32 = arith.constant 4 : i32
    %c0_21 = arith.constant 0 : index
    %c0_22 = arith.constant 0 : index
    %67 = vector.load %arg5[%c0_21, %c0_22] : memref<1x128xf32, #tpu.memory_space<vmem>>, vector<1x128xf32>
    %68 = arith.addf %67, %66 : vector<1x128xf32>
    %c0_23 = arith.constant 0 : index
    %c0_24 = arith.constant 0 : index
    %69 = vector.load %arg5[%c0_23, %c0_24] : memref<1x128xf32, #tpu.memory_space<vmem>>, vector<1x128xf32>
    tpu.vector_store %arg5[%c0_23, %c0_24], %68 {strides = array<i32>} : memref<1x128xf32, #tpu.memory_space<vmem>>, vector<1x128xf32>,
    %c0_i32_25 = arith.constant 0 : i32
    %70 = arith.cmpi eq, %arg1, %c0_i32_25 : i32
    %71 = arith.extui %70 : i1 to i32
    %c0_i32_26 = arith.constant 0 : i32
    %72 = arith.cmpi ne, %71, %c0_i32_26 : i32
    scf.if %72 {
      %c1_27 = arith.constant 1 : index
      %c0_28 = arith.constant 0 : index
      %73 = vector.load %arg3[%c1_27, %c0_28] : memref<4x128xf32, #tpu.memory_space<vmem>>, vector<1x128xf32>
      %c2 = arith.constant 2 : index
      %c0_29 = arith.constant 0 : index
      %74 = vector.load %arg3[%c2, %c0_29] : memref<4x128xf32, #tpu.memory_space<vmem>>, vector<1x128xf32>
      %c3 = arith.constant 3 : index
      %c0_30 = arith.constant 0 : index
      %75 = vector.load %arg3[%c3, %c0_30] : memref<4x128xf32, #tpu.memory_space<vmem>>, vector<1x128xf32>
      %c0_31 = arith.constant 0 : index
      %c0_32 = arith.constant 0 : index
      %76 = vector.load %arg5[%c0_31, %c0_32] : memref<1x128xf32, #tpu.memory_space<vmem>>, vector<1x128xf32>
      %cst_33 = arith.constant 1.17549435E-38 : f32
      %77 = vector.broadcast %cst_33 : f32 to vector<1x128xf32>
      %78 = arith.maximumf %76, %77 : vector<1x128xf32>
      %79 = math.log %78 : vector<1x128xf32>
      %80 = math.log %75 : vector<1x128xf32>
      %81 = arith.subf %79, %80 : vector<1x128xf32>
      %82 = arith.subf %73, %81 : vector<1x128xf32>
      %83 = arith.mulf %82, %74 : vector<1x128xf32>
      %c0_34 = arith.constant 0 : index
      %c0_35 = arith.constant 0 : index
      %84 = vector.load %arg4[%c0_34, %c0_35] : memref<1x128xf32, #tpu.memory_space<vmem>>, vector<1x128xf32>
      tpu.vector_store %arg4[%c0_34, %c0_35], %83 {strides = array<i32>} : memref<1x128xf32, #tpu.memory_space<vmem>>, vector<1x128xf32>,
    } else {
    }
    return
  }
  func.func @transform_0(%arg0: i32, %arg1: i32) -> (i32, i32) {
    %c0_i32 = arith.constant 0 : i32
    %c0_i32_0 = arith.constant 0 : i32
    return %arg1, %c0_i32 : i32, i32
  }
  func.func @transform_1(%arg0: i32, %arg1: i32) -> (i32, i32) {
    %c0_i32 = arith.constant 0 : i32
    %c0_i32_0 = arith.constant 0 : i32
    return %c0_i32, %arg0 : i32, i32
  }
  func.func @transform_2(%arg0: i32, %arg1: i32) -> (i32, i32) {
    %c0_i32 = arith.constant 0 : i32
    %c0_i32_0 = arith.constant 0 : i32
    return %c0_i32, %arg0 : i32, i32
  }
}

</mosaic_0001>

<bundles_post_ra>
// kernel: tpu_custom_call.1
= control target key start
LH: loop header
LB: loop body
LE: loop exit
PB: predicated region body
PF: predicated region fallthrough
CT: control target
= control target key end

     0   :  { %7 = vsyncpa [#allocation4], 0  ;;  %s1236_s0 = inlined_call_operand.vmem [shape: f32[256,2], index: 0, kind: input, shape index: {}]   ;;  %s1237_s1 = inlined_call_operand.vmem [shape: f32[4,256], index: 1, kind: input, shape index: {}]   ;;  %s1238_s2 = inlined_call_operand.hbm [shape: f32[1,256], index: 2, kind: output, shape index: {}]  }
   0x1   :  { %9 = vsyncpa [#allocation4 + $0x1], 0  ;;  %s952_s9 = smov 0   ;;  %s954_s10 = smov 0  }
   0x2   :  { %s956_s11 = smov 0   ;;  %s958_s12 = smov 0  }
   0x3   :  { %s960_s13 = smov 0   ;;  %s962_s14 = smov 0  }
   0x4 LB: > { %s735_s15 = sadd.s32 4294967295, %s931_s14   ;;  %s736_s16 = sadd.s32 4294967294, %s931_s14   ;;  %s931_s14 = sphi %s962_s14, %s15_s14   ;;  %s927_s13 = sphi %s960_s13, %s1245_s13   ;;  %s923_s12 = sphi %s958_s12, %s1244_s12   ;;  %s919_s11 = sphi %s956_s11, %s1243_s11   ;;  %s915_s10 = sphi %s954_s10, %s1242_s10   ;;  %s911_s9 = sphi %s952_s9, %s1241_s9  }
   0x5   : > { %s27_s17 = sadd.s32 1, %s927_s13  ;;  %s86_s18 = sadd.s32 1, %s919_s11 }
   0x6   : > { %p29_p0 = scmp.ge.s32.totalorder %s27_s17, 2  ;;  %p96_p1 = scmp.ne.s32.totalorder %s919_s11, %s915_s10 }
   0x7   : > { %p97_p2 = scmp.eq.s32.totalorder %s735_s15, 1  ;;  %p102_p3 = scmp.ne.s32.totalorder %s915_s10, %s911_s9 }
   0x8   : > { %s1247_s17 = smov (%p29_p0, %s27_s17), 0  ;;  %p103_p5 = scmp.eq.s32.totalorder %s736_s16, 1 }
   0x9   : > { %p992_p4 = por %p97_p2, %p96_p1  ;;  %s83_s20 = ssub.s32 %s927_s13, %s1247_s17 }
   0xa   : > { %p740_p6 = scmp.ge.s32.totalorder %s931_s14, 1  ;;  %p84_p7 = scmp.eq.s32.totalorder %s83_s20, 0 }
   0xb   : > { %p999_p8 = por %p103_p5, %p102_p3  ;;  %p137_p9 = scmp.lt.s32.totalorder %s931_s14, 3 }
   0xc   : > { %s1005_s22 = scalar_select %p84_p7, %s919_s11, %s86_s18  }
   0xd   : > { %p138_p10 = pnand %p740_p6, %p137_p9 }
   0xe   : > { %v184_v0 = vld [vmem:[%s1236_s0 + $0x10] sm:$0xff] (!%p138_p10)  ;;  %v182_v1 = vld [vmem:[%s1236_s0] sm:$0xff] (!%p138_p10)  ;;  %v933_v2 = vmov (!%p138_p10), 1   ;;  %v934_v3 = vmov (!%p138_p10), 0   ;;  %v185_v4 = vld [vmem:[%s1236_s0 + $0x18] sm:$0xff] (!%p138_p10)  ;;  %p168_p11 = scmp.lt.s32.totalorder (!%p138_p10), %s923_s12, 1 }
   0xf   : > { %141 = sbr.rel (%p138_p10) target bundleno = 367 (0x16f), region = 28  ;;  %829 = vset.pattern.permute.xlu0 (!%p138_p10), %v933_v2  ;;  %828 = vset.pattern.permute.xlu1 (!%p138_p10), %v934_v3  ;;  %v187_v5 = vld [vmem:[%s1236_s0 + $0x28] sm:$0xff] (!%p138_p10)  ;;  %v189_v6 = vld [vmem:[%s1236_s0 + $0x38] sm:$0xff] (!%p138_p10)  ;;  %v743_v7 = vld [vmem:[%s1236_s0 + $0x40] sm:$0xff] (!%p138_p10)  ;;  %v935_v62 = vmov (!%p138_p10), 0.0   ;;  %s160_s16 = sand.u32 (!%p138_p10), 1, %s915_s10  }
  0x10   : > { %202 = vperm.xlu1 (!%p138_p10), %828, %v184_v0   ;;  %239 = vperm.xlu0 (!%p138_p10), %829, %v182_v1   ;;  %v183_v8 = vld [vmem:[%s1236_s0 + $0x8] sm:$0xff] (!%p138_p10)  ;;  %v746_v9 = vld [vmem:[%s1236_s0 + $0x58] sm:$0xff] (!%p138_p10)  ;;  %v186_v11 = vld [vmem:[%s1236_s0 + $0x20] sm:$0xff] (!%p138_p10)  ;;  %176 = vst [vmem:[#allocation2] sm:$0x1] (!%p138_p10), %v935_v62  ;;  %s767_s18 = sshll.u32 (!%p138_p10), %s923_s12, 4 }
  0x11   : > { %v748_v10 = vld [vmem:[%s1236_s0 + $0x68] sm:$0xff] (!%p138_p10)  ;;  %v750_v12 = vld [vmem:[%s1236_s0 + $0x78] sm:$0xff] (!%p138_p10)  ;;  %v188_v13 = vld [vmem:[%s1236_s0 + $0x30] sm:$0xff] (!%p138_p10)  ;;  %s161_s20 = scalar_lea.vmem (!%p138_p10), [#allocation3], %s160_s16  ;;  %s1189_s26 = scalar_lea.hbm (!%p138_p10), %s1238_s2, %s767_s18 }
  0x12   : > { %v759_v14 = vld [vmem:[%s1236_s0 + $0xc0] sm:$0xff] (!%p138_p10)  ;;  %v745_v16 = vld [vmem:[%s1236_s0 + $0x50] sm:$0xff] (!%p138_p10)  ;;  %v744_v18 = vld [vmem:[%s1236_s0 + $0x48] sm:$0xff] (!%p138_p10)  ;;  %s657_s23 = sshll.u32 (!%p138_p10), %s161_s20, 4  ;;  %s645_s27 = scalar_lea.sflag (!%p138_p10), [#allocation4], %s160_s16  ;;  %s1191_s23 = int_to_ptr.vmem [resolvable:$true] %s657_s23 }
  0x13   : > { %v755_v15 = vld [vmem:[%s1236_s0 + $0xa0] sm:$0xff] (!%p138_p10)  ;;  %v757_v17 = vld [vmem:[%s1236_s0 + $0xb0] sm:$0xff] (!%p138_p10)  ;;  %v752_v22 = vld [vmem:[%s1236_s0 + $0x88] sm:$0xff] (!%p138_p10)  ;;  %s853_s28 = scalar_lea.vmem (!%p138_p10), %s1191_s23, 16 }
  0x14   : > { %207 = vperm.xlu1 (!%p138_p10), %828, %v185_v4   ;;  %251 = vperm.xlu0 (!%p138_p10), %829, %v185_v4   ;;  %v747_v19 = vld [vmem:[%s1236_s0 + $0x60] sm:$0xff] (!%p138_p10)  ;;  %v749_v20 = vld [vmem:[%s1236_s0 + $0x70] sm:$0xff] (!%p138_p10)  ;;  %v760_v24 = vld [vmem:[%s1236_s0 + $0xc8] sm:$0xff] (!%p138_p10)  ;;  %p854_p12 = scmp.ne.s32.totalorder (!%p138_p10), %s1191_s23, %s853_s28 }
  0x15   : > { %v751_v21 = vld [vmem:[%s1236_s0 + $0x80] sm:$0xff] (!%p138_p10)  ;;  %v753_v23 = vld [vmem:[%s1236_s0 + $0x90] sm:$0xff] (!%p138_p10)  ;;  %v754_v27 = vld [vmem:[%s1236_s0 + $0x98] sm:$0xff] (!%p138_p10) }
  0x16   : > { %v761_v25 = vld [vmem:[%s1236_s0 + $0xd0] sm:$0xff]  ;;  %v763_v26 = vld [vmem:[%s1236_s0 + $0xe0] sm:$0xff]  ;;  %v766_v29 = vld [vmem:[%s1236_s0 + $0xf8] sm:$0xff]  ;;  %s169_s29 = scalar_select %p168_p11, %s923_s12, 1 }
  0x17   : > { %v765_v28 = vld [vmem:[%s1236_s0 + $0xf0] sm:$0xff]  ;;  %v762_v30 = vld [vmem:[%s1236_s0 + $0xd8] sm:$0xff]  ;;  %v756_v31 = vld [vmem:[%s1236_s0 + $0xa8] sm:$0xff]  ;;  %p855_p13 = pnand %p854_p12, %p992_p4  ;;  %s936_s12 = smov [#allocation3]  }
  0x18   : > { %217 = vperm.xlu1 %828, %v187_v5   ;;  %259 = vperm.xlu0 %829, %v187_v5   ;;  %s741_s30 = sshll.u32 %s169_s29, 2  ;;  %v764_v40 = vld [vmem:[%s1236_s0 + $0xe8] sm:$0xff]  ;;  %v758_v47 = vld [vmem:[%s1236_s0 + $0xb8] sm:$0xff]  ;;  %s857_s29 = sshll.u32 %s936_s12, 4  ;;  %s858_s29 = int_to_ptr.vmem [resolvable:$false] %s857_s29 }
  0x19   : > { %s1118_s5 = scalar_lea.vmem %s1237_s1, %s741_s30  ;;  %p856_p0 = pneg %p855_p13 }
  0x1a   : > { %v1122_v34 = vld [vmem:[%s1118_s5] ss:$0 sm:$0xff]  ;;  %s859_s30 = scalar_lea.vmem %s858_s29, 32  ;;  %p860_p1 = scmp.lt.s32.totalorder %s1191_s23, %s858_s29 }
  0x1b   : > { %p861_p2 = scmp.lt.s32.totalorder %s859_s30, %s853_s28 }
  0x1c   : > { %227 = vperm.xlu1 %828, %v189_v6   ;;  %267 = vperm.xlu0 %829, %v189_v6  }
  0x1d   : > { %p862_p3 = por %p861_p2, %p860_p1 }
  0x1f   : > { %p863_p5 = pnand %p862_p3, %p856_p0 }
  0x20   : > { %830 = vset.pattern.permute.xlu1 %v933_v2  ;;  %350 = vperm.xlu0 %829, %v743_v7  }
  0x21   : > { %243 = vperm.xlu1 %830, %v183_v8  }
  0x24   : > { %362 = vperm.xlu0 %829, %v746_v9  }
  0x25   : > { %247 = vperm.xlu1 %830, %v184_v0  }
  0x28   : > { %370 = vperm.xlu0 %829, %v748_v10  }
  0x29   : > { %255 = vperm.xlu1 %830, %v186_v11  }
  0x2c   : > { %378 = vperm.xlu0 %829, %v750_v12  }
  0x2d   : > { %263 = vperm.xlu1 %830, %v188_v13  }
  0x30   : > { %572 = vperm.xlu0 %829, %v759_v14  }
  0x31   : > { %831 = vset.pattern.permute.xlu1 %v934_v3 }
  0x32   : > { %303 = vperm.xlu1 %831, %v743_v7  }
  0x34   : > { %477 = vperm.xlu0 %829, %v755_v15  }
  0x36   : > { %313 = vperm.xlu1 %831, %v745_v16  }
  0x38   : > { %485 = vperm.xlu0 %829, %v757_v17  }
  0x3a   : > { %318 = vperm.xlu1 %831, %v746_v9  }
  0x3c   : > { %844 = vset.pattern.permute.xlu0 %v934_v3 }
  0x3d   : > { %192 = vperm.xlu0 %844, %v182_v1  }
  0x3e   : > { %328 = vperm.xlu1 %831, %v748_v10  }
  0x41   : > { %197 = vperm.xlu0 %844, %v183_v8  }
  0x42   : > { %338 = vperm.xlu1 %831, %v750_v12  }
  0x45   : > { %212 = vperm.xlu0 %844, %v186_v11  }
  0x46   : > { %832 = vset.pattern.permute.xlu1 %v933_v2 }
  0x47   : > { %354 = vperm.xlu1 %832, %v744_v18  }
  0x49   : > { %222 = vperm.xlu0 %844, %v188_v13  }
  0x4b   : > { %358 = vperm.xlu1 %832, %v745_v16  }
  0x4d   : > { %308 = vperm.xlu0 %844, %v744_v18  }
  0x4f   : > { %366 = vperm.xlu1 %832, %v747_v19  }
  0x51   : > { %323 = vperm.xlu0 %844, %v747_v19  }
  0x53   : > { %374 = vperm.xlu1 %832, %v749_v20  }
  0x55   : > { %333 = vperm.xlu0 %844, %v749_v20  }
  0x57   : > { %833 = vset.pattern.permute.xlu1 %v934_v3 }
  0x58   : > { %414 = vperm.xlu1 %833, %v751_v21  }
  0x59   : > { %419 = vperm.xlu0 %844, %v752_v22  }
  0x5c   : > { %834 = vset.pattern.permute.xlu1 %v933_v2 }
  0x5d   : > { %461 = vperm.xlu1 %834, %v751_v21   ;;  %424 = vperm.xlu0 %844, %v753_v23  }
  0x61   : > { %465 = vperm.xlu1 %834, %v752_v22   ;;  %530 = vperm.xlu0 %844, %v760_v24  }
  0x65   : > { %835 = vset.pattern.permute.xlu1 %v934_v3  ;;  %535 = vperm.xlu0 %844, %v761_v25  }
  0x66   : > { %525 = vperm.xlu1 %835, %v759_v14  }
  0x69   : > { %434 = vperm.xlu0 %844, %v755_v15  }
  0x6a   : > { %836 = vset.pattern.permute.xlu1 %v933_v2 }
  0x6b   : > { %469 = vperm.xlu1 %836, %v753_v23  }
  0x6d   : > { %545 = vperm.xlu0 %844, %v763_v26  }
  0x6f   : > { %576 = vperm.xlu1 %836, %v760_v24  }
  0x71   : > { %444 = vperm.xlu0 %844, %v757_v17  }
  0x73   : > { %837 = vset.pattern.permute.xlu1 %v934_v3 }
  0x74   : > { %429 = vperm.xlu1 %837, %v754_v27  }
  0x75   : > { %555 = vperm.xlu0 %844, %v765_v28  }
  0x78   : > { %838 = vset.pattern.permute.xlu1 %v933_v2 }
  0x79   : > { %473 = vperm.xlu1 %838, %v754_v27   ;;  %560 = vperm.xlu0 %844, %v766_v29  }
  0x7d   : > { %580 = vperm.xlu1 %838, %v761_v25   ;;  %848 = vset.pattern.permute.xlu0 %v933_v2 }
  0x81   : > { %839 = vset.pattern.permute.xlu1 %v934_v3 }
  0x82   : > { %540 = vperm.xlu1 %839, %v762_v30  }
  0x86   : > { %840 = vset.pattern.permute.xlu1 %v933_v2 }
  0x87   : > { %584 = vperm.xlu1 %840, %v762_v30  }
  0x8b   : > { %841 = vset.pattern.permute.xlu1 %v934_v3 }
  0x8c   : > { %439 = vperm.xlu1 %841, %v756_v31  }
  0x8f   : > { %v203_v32 = vpop.permute.xlu1 %202  ;;  %v240_v33 = vpop.permute.xlu0 %239 }
  0x90   : > { %842 = vset.pattern.permute.xlu1 %v933_v2  ;;  %vm232_vm3 = vcmp.le.f32.partialorder %v1122_v34, %v203_v32 }
  0x91   : > { %481 = vperm.xlu1 %842, %v756_v31  }
  0x93   : > { %v208_v35 = vpop.permute.xlu1 %207  ;;  %v252_v36 = vpop.permute.xlu0 %251 }
  0x94   : > { %vm233_vm0 = vcmp.le.f32.partialorder %v1122_v34, %v208_v35 }
  0x95   : > { %v273_v37 = vsel %vm233_vm0, %v252_v36, 0.0  ;;  %588 = vperm.xlu1 %842, %v763_v26  }
  0x97   : > { %v218_v38 = vpop.permute.xlu1 %217  ;;  %v260_v39 = vpop.permute.xlu0 %259 }
  0x98   : > { %vm235_vm1 = vcmp.le.f32.partialorder %v1122_v34, %v218_v38 }
  0x99   : > { %v275_v41 = vsel %vm235_vm1, %v260_v39, 0.0  ;;  %843 = vset.pattern.permute.xlu1 %v934_v3 }
  0x9a   : > { %550 = vperm.xlu1 %843, %v764_v40  }
  0x9b   : > { %v228_v42 = vpop.permute.xlu1 %227  ;;  %v268_v43 = vpop.permute.xlu0 %267 }
  0x9c   : > { %vm237_vm2 = vcmp.le.f32.partialorder %v1122_v34, %v228_v42 }
  0x9d   : > { %v1131_v44 = vsel %vm237_vm2, %v268_v43, 0.0 }
  0x9e   : > { %845 = vset.pattern.permute.xlu1 %v933_v2 }
  0x9f   : > { %592 = vperm.xlu1 %845, %v764_v40   ;;  %v351_v45 = vpop.permute.xlu0 %350 }
  0xa0   : > { %v244_v46 = vpop.permute.xlu1 %243 }
  0xa3   : > { %846 = vset.pattern.permute.xlu1 %v934_v3  ;;  %v363_v48 = vpop.permute.xlu0 %362 }
  0xa4   : > { %449 = vperm.xlu1 %846, %v758_v47   ;;  %v248_v49 = vpop.permute.xlu1 %247 }
  0xa5   : > { %v272_v50 = vsel %vm232_vm3, %v248_v49, 0.0 }
  0xa7   : > { %v371_v51 = vpop.permute.xlu0 %370 }
  0xa8   : > { %847 = vset.pattern.permute.xlu1 %v933_v2  ;;  %v256_v52 = vpop.permute.xlu1 %255 }
  0xa9   : > { %489 = vperm.xlu1 %847, %v758_v47  }
  0xab   : > { %v379_v53 = vpop.permute.xlu0 %378 }
  0xac   : > { %v264_v54 = vpop.permute.xlu1 %263 }
  0xad   : > { %596 = vperm.xlu1 %847, %v765_v28  }
  0xaf   : > { %v1140_v55 = vpop.permute.xlu0 %572 }
  0xb1   : > { %600 = vperm.xlu1 %847, %v766_v29   ;;  %v304_v56 = vpop.permute.xlu1 %303 }
  0xb2   : > { %vm341_vm4 = vcmp.le.f32.partialorder %v1122_v34, %v304_v56 }
  0xb3   : > { %v381_v57 = vsel %vm341_vm4, %v351_v45, 0.0  ;;  %v1143_v58 = vpop.permute.xlu0 %477 }
  0xb5   : > { %v314_v59 = vpop.permute.xlu1 %313 }
  0xb6   : > { %vm343_vm12 = vcmp.le.f32.partialorder %v1122_v34, %v314_v59 }
  0xb7   : > { %v1145_v60 = vpop.permute.xlu0 %485 }
  0xb9   : > { %v319_v61 = vpop.permute.xlu1 %318 }
  0xba   : > { %vm344_vm5 = vcmp.le.f32.partialorder %v1122_v34, %v319_v61 }
  0xbb   : > { %v384_v63 = vsel %vm344_vm5, %v363_v48, 0.0 }
  0xbc   : > { %v193_v0 = vpop.permute.xlu0 %192 }
  0xbd   : > { %vm230_vm6 = vcmp.le.f32.partialorder %v1122_v34, %v193_v0  ;;  %v329_v1 = vpop.permute.xlu1 %328 }
  0xbe   : > { %vm346_vm7 = vcmp.le.f32.partialorder %v1122_v34, %v329_v1  ;;  %v270_v3 = vsel %vm230_vm6, %v240_v33, 0.0 }
  0xbf   : > { %v386_v2 = vsel %vm346_vm7, %v371_v51, 0.0 }
  0xc0   : > { %v198_v4 = vpop.permute.xlu0 %197 }
  0xc1   : > { %vm231_vm8 = vcmp.le.f32.partialorder %v1122_v34, %v198_v4  ;;  %v339_v5 = vpop.permute.xlu1 %338 }
  0xc2   : > { %v271_v6 = vsel %vm231_vm8, %v244_v46, 0.0  ;;  %vm348_vm9 = vcmp.le.f32.partialorder %v1122_v34, %v339_v5 }
  0xc3   : > { %v278_v7 = vadd.f32 %v271_v6, %v270_v3  ;;  %v388_v8 = vsel %vm348_vm9, %v379_v53, 0.0 }
  0xc4   : > { %v213_v9 = vpop.permute.xlu0 %212 }
  0xc5   : > { %v279_v10 = vadd.f32 %v278_v7, %v272_v50  ;;  %vm234_vm10 = vcmp.le.f32.partialorder %v1122_v34, %v213_v9 }
  0xc6   : > { %v355_v11 = vpop.permute.xlu1 %354  ;;  %v274_v13 = vsel %vm234_vm10, %v256_v52, 0.0 }
  0xc7   : > { %v280_v12 = vadd.f32 %v279_v10, %v273_v37 }
  0xc8   : > { %v223_v14 = vpop.permute.xlu0 %222 }
  0xc9   : > { %v281_v15 = vadd.f32 %v280_v12, %v274_v13  ;;  %vm236_vm11 = vcmp.le.f32.partialorder %v1122_v34, %v223_v14 }
  0xca   : > { %v359_v16 = vpop.permute.xlu1 %358  ;;  %v276_v19 = vsel %vm236_vm11, %v264_v54, 0.0 }
  0xcb   : > { %v282_v17 = vadd.f32 %v281_v15, %v275_v41  ;;  %v383_v18 = vsel %vm343_vm12, %v359_v16, 0.0 }
  0xcc   : > { %v309_v20 = vpop.permute.xlu0 %308 }
  0xcd   : > { %v283_v21 = vadd.f32 %v282_v17, %v276_v19  ;;  %vm342_vm13 = vcmp.le.f32.partialorder %v1122_v34, %v309_v20 }
  0xce   : > { %v382_v22 = vsel %vm342_vm13, %v355_v11, 0.0  ;;  %v367_v23 = vpop.permute.xlu1 %366 }
  0xcf   : > { %v284_v24 = vadd.f32 %v283_v21, %v1131_v44  ;;  %v389_v25 = vadd.f32 %v382_v22, %v381_v57 }
  0xd0   : > { %v324_v26 = vpop.permute.xlu0 %323 }
  0xd1   : > { %v390_v27 = vadd.f32 %v389_v25, %v383_v18  ;;  %vm345_vm14 = vcmp.le.f32.partialorder %v1122_v34, %v324_v26  ;;  %v285_v29 = vrot.slane %v284_v24, 4 }
  0xd2   : > { %v375_v28 = vpop.permute.xlu1 %374  ;;  %v385_v31 = vsel %vm345_vm14, %v367_v23, 0.0 }
  0xd3   : > { %v391_v30 = vadd.f32 %v390_v27, %v384_v63  ;;  %v286_v35 = vadd.f32 %v285_v29, %v284_v24 }
  0xd4   : > { %v334_v32 = vpop.permute.xlu0 %333 }
  0xd5   : > { %v392_v33 = vadd.f32 %v391_v30, %v385_v31  ;;  %vm347_vm15 = vcmp.le.f32.partialorder %v1122_v34, %v334_v32  ;;  %v287_v40 = vrot.slane %v286_v35, 2 }
  0xd6   : > { %v387_v38 = vsel %vm347_vm15, %v375_v28, 0.0 }
  0xd7   : > { %v393_v36 = vadd.f32 %v392_v33, %v386_v2  ;;  %v415_v37 = vpop.permute.xlu1 %414  ;;  %v288_v44 = vadd.f32 %v287_v40, %v286_v35 }
  0xd8   : > { %v420_v63 = vpop.permute.xlu0 %419  ;;  %vm452_vm2 = vcmp.le.f32.partialorder %v1122_v34, %v415_v37 }
  0xd9   : > { %v394_v39 = vadd.f32 %v393_v36, %v387_v38  ;;  %v289_v48 = vrot.slane %v288_v44, 1  ;;  %vm453_vm0 = vcmp.le.f32.partialorder %v1122_v34, %v420_v63 }
  0xdb   : > { %v395_v41 = vadd.f32 %v394_v39, %v388_v8  ;;  %v290_v52 = vadd.f32 %v289_v48, %v288_v44 }
  0xdc   : > { %v462_v42 = vpop.permute.xlu1 %461  ;;  %v425_v1 = vpop.permute.xlu0 %424 }
  0xdd   : > { %v396_v43 = vrot.slane %v395_v41, 4  ;;  %vm454_vm1 = vcmp.le.f32.partialorder %v1122_v34, %v425_v1  ;;  %v492_v10 = vsel %vm452_vm2, %v462_v42, 0.0 }
  0xdf   : > { %v397_v45 = vadd.f32 %v396_v43, %v395_v41 }
  0xe0   : > { %v466_v46 = vpop.permute.xlu1 %465  ;;  %v531_v3 = vpop.permute.xlu0 %530 }
  0xe1   : > { %v398_v47 = vrot.slane %v397_v45, 2  ;;  %v493_v9 = vsel %vm453_vm0, %v466_v46, 0.0  ;;  %vm564_vm5 = vcmp.le.f32.partialorder %v1122_v34, %v531_v3 }
  0xe2   : > { %v500_v13 = vadd.f32 %v493_v9, %v492_v10  ;;  %v632_v10 = vld [vmem:[%s1118_s5 + $0x2] sm:$0x1] }
  0xe3   : > { %v399_v49 = vadd.f32 %v398_v47, %v397_v45 }
  0xe4   : > { %v536_v5 = vpop.permute.xlu0 %535 }
  0xe5   : > { %v400_v50 = vrot.slane %v399_v49, 1  ;;  %v526_v51 = vpop.permute.xlu1 %525  ;;  %vm565_vm8 = vcmp.le.f32.partialorder %v1122_v34, %v536_v5 }
  0xe6   : > { %vm563_vm7 = vcmp.le.f32.partialorder %v1122_v34, %v526_v51 }
  0xe7   : > { %v401_v53 = vadd.f32 %v400_v50, %v399_v49  ;;  %v603_v26 = vsel %vm563_vm7, %v1140_v55, 0.0 }
  0xe8   : > { %v435_v8 = vpop.permute.xlu0 %434 }
  0xe9   : > { %v1159_v54 = vadd.f32 %v401_v53, %v290_v52  ;;  %vm456_vm4 = vcmp.le.f32.partialorder %v1122_v34, %v435_v8 }
  0xea   : > { %v470_v56 = vpop.permute.xlu1 %469  ;;  %v496_v19 = vsel %vm456_vm4, %v1143_v58, 0.0 }
  0xeb   : > { %v494_v11 = vsel %vm454_vm1, %v470_v56, 0.0 }
  0xec   : > { %v546_v14 = vpop.permute.xlu0 %545  ;;  %v501_v16 = vadd.f32 %v500_v13, %v494_v11 }
  0xed   : > { %vm567_vm11 = vcmp.le.f32.partialorder %v1122_v34, %v546_v14 }
  0xee   : > { %v577_v57 = vpop.permute.xlu1 %576 }
  0xef   : > { %v604_v23 = vsel %vm564_vm5, %v577_v57, 0.0 }
  0xf0   : > { %v445_v20 = vpop.permute.xlu0 %444  ;;  %v611_v28 = vadd.f32 %v604_v23, %v603_v26 }
  0xf1   : > { %vm458_vm9 = vcmp.le.f32.partialorder %v1122_v34, %v445_v20 }
  0xf2   : > { %v498_v58 = vsel %vm458_vm9, %v1145_v60, 0.0 }
  0xf3   : > { %v430_v59 = vpop.permute.xlu1 %429 }
  0xf4   : > { %vm455_vm3 = vcmp.le.f32.partialorder %v1122_v34, %v430_v59  ;;  %v556_v29 = vpop.permute.xlu0 %555 }
  0xf5   : > { %vm569_vm14 = vcmp.le.f32.partialorder %v1122_v34, %v556_v29 }
  0xf8   : > { %v474_v61 = vpop.permute.xlu1 %473  ;;  %v561_v41 = vpop.permute.xlu0 %560 }
  0xf9   : > { %v495_v15 = vsel %vm455_vm3, %v474_v61, 0.0  ;;  %vm570_vm15 = vcmp.le.f32.partialorder %v1122_v34, %v561_v41 }
  0xfa   : > { %v502_v17 = vadd.f32 %v501_v16, %v495_v15 }
  0xfc   : > { %v581_v62 = vpop.permute.xlu1 %580  ;;  %v503_v22 = vadd.f32 %v502_v17, %v496_v19 }
  0xfd   : > { %v605_v27 = vsel %vm565_vm8, %v581_v62, 0.0 }
  0xfe   : > { %v612_v31 = vadd.f32 %v611_v28, %v605_v27 }
 0x101   : > { %v541_v0 = vpop.permute.xlu1 %540 }
 0x102   : > { %vm566_vm10 = vcmp.le.f32.partialorder %v1122_v34, %v541_v0 }
 0x106   : > { %v585_v2 = vpop.permute.xlu1 %584 }
 0x107   : > { %v606_v30 = vsel %vm566_vm10, %v585_v2, 0.0  ;;  %v633_v2 = vld [vmem:[%s1118_s5 + $0x3] sm:$0x1] }
 0x108   : > { %v613_v37 = vadd.f32 %v612_v31, %v606_v30  ;;  %849 = vlog2.f32 %v633_v2 }
 0x10b   : > { %v440_v4 = vpop.permute.xlu1 %439 }
 0x10c   : > { %vm457_vm6 = vcmp.le.f32.partialorder %v1122_v34, %v440_v4 }
 0x110   : > { %v482_v6 = vpop.permute.xlu1 %481 }
 0x111   : > { %v497_v21 = vsel %vm457_vm6, %v482_v6, 0.0 }
 0x112   : > { %v504_v25 = vadd.f32 %v503_v22, %v497_v21  ;;  %v850_v5 = vpop.eup %849 }
 0x113   : > { %v639_v6 = vmul.f32 0.6931472, %v850_v5 }
 0x114   : > { %v589_v7 = vpop.permute.xlu1 %588  ;;  %v505_v33 = vadd.f32 %v504_v25, %v498_v58 }
 0x115   : > { %v607_v35 = vsel %vm567_vm11, %v589_v7, 0.0 }
 0x116   : > { %v614_v39 = vadd.f32 %v613_v37, %v607_v35 }
 0x119   : > { %v551_v12 = vpop.permute.xlu1 %550 }
 0x11a   : > { %vm568_vm13 = vcmp.le.f32.partialorder %v1122_v34, %v551_v12 }
 0x11e   : > { %v593_v18 = vpop.permute.xlu1 %592 }
 0x11f   : > { %v608_v38 = vsel %vm568_vm13, %v593_v18, 0.0 }
 0x120   : > { %v615_v43 = vadd.f32 %v614_v39, %v608_v38 }
 0x123   : > { %v450_v24 = vpop.permute.xlu1 %449 }
 0x124   : > { %vm459_vm12 = vcmp.le.f32.partialorder %v1122_v34, %v450_v24  ;;  %v625_v34 = vld [vmem:[#allocation2] sm:$0x1] }
 0x128   : > { %v490_v32 = vpop.permute.xlu1 %489 }
 0x129   : > { %v499_v36 = vsel %vm459_vm12, %v490_v32, 0.0 }
 0x12a   : > { %v506_v55 = vadd.f32 %v505_v33, %v499_v36 }
 0x12c   : > { %v507_v60 = vrot.slane %v506_v55, 4  ;;  %v597_v40 = vpop.permute.xlu1 %596 }
 0x12d   : > { %v609_v42 = vsel %vm569_vm14, %v597_v40, 0.0 }
 0x12e   : > { %v508_v44 = vadd.f32 %v507_v60, %v506_v55  ;;  %v616_v46 = vadd.f32 %v615_v43, %v609_v42 }
 0x130   : > { %v509_v45 = vrot.slane %v508_v44, 2  ;;  %v601_v47 = vpop.permute.xlu1 %600 }
 0x131   : > { %v610_v48 = vsel %vm570_vm15, %v601_v47, 0.0 }
 0x132   : > { %v510_v49 = vadd.f32 %v509_v45, %v508_v44  ;;  %v617_v50 = vadd.f32 %v616_v46, %v610_v48 }
 0x134   : > { %v618_v51 = vrot.slane %v617_v50, 4  ;;  %v511_v52 = vrot.slane %v510_v49, 1 }
 0x136   : > { %v619_v53 = vadd.f32 %v618_v51, %v617_v50  ;;  %v512_v57 = vadd.f32 %v511_v52, %v510_v49 }
 0x138   : > { %v620_v56 = vrot.slane %v619_v53, 2  ;;  %v513_v62 = vadd.f32 %v512_v57, %v1159_v54  ;;  %v631_v54 = vld [vmem:[%s1118_s5 + $0x1] sm:$0x1] }
 0x13a   : > { %v621_v59 = vadd.f32 %v620_v56, %v619_v53 }
 0x13c   : > { %v622_v61 = vrot.slane %v621_v59, 1 }
 0x13e   : > { %v623_v63 = vadd.f32 %v622_v61, %v621_v59 }
 0x140   : > { %v624_v0 = vadd.f32 %v623_v63, %v513_v62 }
 0x142   : > { %v626_v1 = vadd.f32 %v625_v34, %v624_v0 }
 0x144   : > { %627 = vst [vmem:[#allocation2] sm:$0x1] %v626_v1 }
 0x14b   : > { %v634_v3 = vld [vmem:[#allocation2] sm:$0x1] }
 0x14c   : > { %v635_v4 = vmax.f32 %v634_v3, 1.1754944e-38 }
 0x14e   : > { %851 = vlog2.f32 %v635_v4 }
 0x158   : > { %v852_v7 = vpop.eup %851 }
 0x159   : > { %v637_v8 = vmul.f32 0.6931472, %v852_v7 }
 0x15b   : > { %v640_v9 = vsub.f32 %v637_v8, %v639_v6 }
 0x15d   : > { %v641_v11 = vsub.f32 %v631_v54, %v640_v9 }
 0x15f   : > { %v642_v12 = vmul.f32 %v641_v11, %v632_v10 }
 0x161   : > { %643 = vst [vmem:[%s161_s20] sm:$0x1] %v642_v12 }
 0x162   : > { %866 = shalt.err (!%p863_p5)
}
 0x163   : > { %s867_s3 = scalar_lea.hbm %s1189_s26, 16  ;;  %s871_s6 = scalar_lea.hbm %s1238_s2, 32 }
 0x164   : > { %p868_p6 = scmp.ne.s32.totalorder %s1189_s26, %s867_s3  ;;  %p872_p10 = scmp.lt.u32.totalorder %s1189_s26, %s1238_s2 }
 0x165   : > { %p873_p11 = scmp.lt.u32.totalorder %s871_s6, %s867_s3  ;;  %p875_p13 = scmp.lt.u32.totalorder %s867_s3, %s1189_s26 }
 0x166   : > { %p869_p7 = pnand %p868_p6, %p992_p4 }
 0x167   : > { %p874_p12 = por %p873_p11, %p872_p10 }
 0x168   : > { %p870_p9 = pneg %p869_p7 }
 0x169   : > { %p876_p0 = por %p875_p13, %p874_p12 }
 0x16b   : > { %p877_p1 = pnand %p876_p0, %p870_p9 }
 0x16d   : > { %880 = shalt.err (!%p877_p1)
}
 0x16e   : > { %770 = dma.vmem_to_hbm [thread:$0]  (%p992_p4), %s1191_s23, 16, %s1189_s26, %s645_s27  }
 0x16f PF: > { %p776_p2 = scmp.ge.s32.totalorder %s931_s14, 2  ;;  %s669_s15 = sand.u32 1, %s911_s9  }
 0x170   : > { %s670_s16 = scalar_lea.sflag [#allocation4], %s669_s15 }
 0x171   : > { %p773_p3 = pnand %p776_p2, %p999_p8 }
 0x173   : > { %906 = dma.done.wait (!%p773_p3), %s670_s16, 16  }
 0x174   : > { %908 = vsyncadd (!%p773_p3), %s670_s16, 4294967280  ;;  %s15_s14 = sadd.s32 1, %s931_s14   ;;  %s1241_s9 = smov %s915_s10 }
 0x175   : > { %p12_p5 = scmp.ge.s32.totalorder %s15_s14, 4   ;;  %s1242_s10 = smov %s919_s11 }
 0x176   : > { %s1243_s11 = smov %s1005_s22  ;;  %s1244_s12 = smov %s927_s13 }
 0x177   : > { %s1245_s13 = smov %s1247_s17  ;;  %14 = sbr.rel (!%p12_p5) target bundleno = 4 (0x4), region = 77 }
 0x17e   :  { %674 = vsyncpa [#allocation4], 1 }
 0x17f   :  { %676 = vsyncpa [#allocation4 + $0x1], 1 }

</bundles_post_ra>
